<compile_context>
chip_gen: v7x
topology: tpu7x:2x2x1
jax: 0.10.0
libtpu: 0.0.40
codegen_flags: <defaults>
</compile_context>

<pallas_src>
import functools

import jax
import jax.numpy as jnp
from jax import lax
from jax.experimental import pallas as pl
from jax.experimental.pallas import tpu as pltpu


def _fused_ir_kernel(*refs, H, W, expand, use_residual):
    if expand:
        (x_ref, we_ref, be_ref, dw_ref, db_ref, wp_ref, bp_ref, mask_ref,
         out_ref, apad_ref) = refs
    else:
        (x_ref, dw_ref, db_ref, wp_ref, bp_ref, mask_ref,
         out_ref, apad_ref) = refs

    HW = H * W
    q0 = W + 1                          # start of the interior in the padded row

    x = x_ref[...].astype(jnp.float32)  # (Cin, H*W)

    # ---- 1x1 expand conv (MXU) + folded BN + SiLU ---------------------------
    if expand:
        a = jnp.dot(we_ref[...], x, preferred_element_type=jnp.float32)
        a = a + be_ref[...]             # (Chid, H*W) + (Chid, 1)
        a = a * jax.nn.sigmoid(a)       # SiLU
    else:
        a = x

    # ---- place hidden activation into a zero-padded VMEM scratch ------------
    # apad layout (flattened rows): [W+1 zeros | H*W interior | W+1 zeros]
    apad_ref[...] = jnp.zeros_like(apad_ref)
    apad_ref[:, q0:q0 + HW] = a

    # ---- 3x3 depthwise conv (9 shifted VPU MACs) + folded BN + SiLU ---------
    wl = mask_ref[0:1, :]               # 0.0 where w == 0     (kills dx=-1 wrap)
    wr = mask_ref[1:2, :]               # 0.0 where w == W - 1 (kills dx=+1 wrap)

    acc = jnp.zeros_like(a)
    t = 0
    for dy in (-1, 0, 1):
        for dx in (-1, 0, 1):
            off = q0 + dy * W + dx
            tap = apad_ref[:, off:off + HW]          # (Chid, H*W)
            contrib = tap * dw_ref[:, t:t + 1]       # per-channel tap weight
            if dx == -1:
                contrib = contrib * wl
            elif dx == 1:
                contrib = contrib * wr
            acc = acc + contrib
            t += 1

    h = acc + db_ref[...]
    h = h * jax.nn.sigmoid(h)           # SiLU

    # ---- 1x1 project conv (MXU) + folded BN (+ residual) --------------------
    y = jnp.dot(wp_ref[...], h, preferred_element_type=jnp.float32)
    y = y + bp_ref[...]
    if use_residual:
        y = y + x
    out_ref[...] = y.astype(out_ref.dtype)


def _fold_bn(w, bn, eps=1e-5):
    """Fold inference-mode BatchNorm (gamma, beta, mean, var) into a bias-free conv."""
    gamma, beta, mean, var = bn
    scale = gamma / jnp.sqrt(var + eps)
    return w * scale[:, None], (beta - mean * scale)[:, None]


def inverted_residual(x, params, *, stride=1, eps=1e-5):
    """Forward pass of InvertedResidual.  x: (N, Cin, H, W) NCHW float32."""
    if stride != 1:
        # TODO(synk): stride>1 not supported by the fused kernel.
        raise NotImplementedError("fused InvertedResidual kernel supports stride=1 only")

    N, Cin, H, W = x.shape
    HW = H * W
    P2 = HW + 2 * (W + 1)               # padded flat spatial length

    dw_w = params["dw_w"]
    Chid = dw_w.shape[0]
    proj_w = params["proj_w"]
    Cout = proj_w.shape[0]
    expand = params.get("expand_w", None) is not None
    use_residual = (Cin == Cout) and (stride == 1)

    # --- fold BatchNorm into the conv weights (all float32) ------------------
    if expand:
        we, be = _fold_bn(params["expand_w"].reshape(Chid, Cin).astype(jnp.float32),
                          params["bn1"], eps)
    dww, db = _fold_bn(dw_w.reshape(Chid, 9).astype(jnp.float32), params["bn2"], eps)
    wp, bp = _fold_bn(proj_w.reshape(Cout, Chid).astype(jnp.float32), params["bn3"], eps)

    # lane masks killing row-wraparound taps of the flattened depthwise conv
    w_idx = jnp.arange(HW, dtype=jnp.int32) % W
    masks = jnp.stack([(w_idx != 0).astype(jnp.float32),
                       (w_idx != W - 1).astype(jnp.float32)], axis=0)   # (2, HW)

    xf = x.reshape(N, Cin, HW)          # free reshape; NCHW layout kept as-is

    def _full(a):
        shape = a.shape
        return pl.BlockSpec(shape, lambda n: (0,) * len(shape))

    in_specs = [pl.BlockSpec((None, Cin, HW), lambda n: (n, 0, 0))]
    inputs = [xf]
    if expand:
        in_specs += [_full(we), _full(be)]
        inputs += [we, be]
    in_specs += [_full(dww), _full(db), _full(wp), _full(bp), _full(masks)]
    inputs += [dww, db, wp, bp, masks]

    kernel = functools.partial(_fused_ir_kernel, H=H, W=W,
                               expand=expand, use_residual=use_residual)

    out = pl.pallas_call(
        kernel,
        out_shape=jax.ShapeDtypeStruct((N, Cout, HW), x.dtype),
        grid_spec=pltpu.PrefetchScalarGridSpec(
            num_scalar_prefetch=0,
            grid=(N,),
            in_specs=in_specs,
            out_specs=pl.BlockSpec((None, Cout, HW), lambda n: (n, 0, 0)),
            scratch_shapes=[pltpu.VMEM((Chid, P2), jnp.float32)],
        ),
        compiler_params=pltpu.CompilerParams(
            dimension_semantics=("parallel",)),
    )(*inputs)

    return out.reshape(N, Cout, H, W)


if __name__ == "__main__":
    key = jax.random.PRNGKey(0)
    keys = jax.random.split(key, 8)

    N, Cin, H, W = 2, 4, 16, 16
    expand_ratio, stride = 6, 1
    Chid = Cin * expand_ratio
    Cout = Cin                          # stride=1 & Cin==Cout -> residual path

    def bn_params(k, c):
        k1, k2, k3, k4 = jax.random.split(k, 4)
        return (jax.random.uniform(k1, (c,), minval=0.5, maxval=1.5),
                0.1 * jax.random.normal(k2, (c,)),
                0.1 * jax.random.normal(k3, (c,)),
                jax.random.uniform(k4, (c,), minval=0.5, maxval=1.5))

    params = {
        "expand_w": jax.random.normal(keys[0], (Chid, Cin, 1, 1)) / (Cin ** 0.5),
        "bn1": bn_params(keys[1], Chid),
        "dw_w": jax.random.normal(keys[2], (Chid, 1, 3, 3)) / 3.0,
        "bn2": bn_params(keys[3], Chid),
        "proj_w": jax.random.normal(keys[4], (Cout, Chid, 1, 1)) / (Chid ** 0.5),
        "bn3": bn_params(keys[5], Cout),
    }
    x = jax.random.normal(keys[6], (N, Cin, H, W), dtype=jnp.float32)

    y = jax.jit(inverted_residual)(x, params)
    y = jax.block_until_ready(y)

    # ---- pure-JAX reference mirroring the PyTorch module --------------------
    def conv2d(v, w, stride_=1, padding=0, groups=1):
        return lax.conv_general_dilated(
            v, w, window_strides=(stride_, stride_),
            padding=[(padding, padding), (padding, padding)],
            dimension_numbers=("NCHW", "OIHW", "NCHW"),
            feature_group_count=groups,
            precision=lax.Precision.HIGHEST)

    def bn_eval(v, bn, eps=1e-5):
        gamma, beta, mean, var = bn
        inv = gamma / jnp.sqrt(var + eps)
        return v * inv[None, :, None, None] + (beta - mean * inv)[None, :, None, None]

    def silu(v):
        return v * jax.nn.sigmoid(v)

    def reference(v, p):
        h = silu(bn_eval(conv2d(v, p["expand_w"]), p["bn1"]))
        h = silu(bn_eval(conv2d(h, p["dw_w"], stride_=stride, padding=1,
                                groups=p["dw_w"].shape[0]), p["bn2"]))
        h = bn_eval(conv2d(h, p["proj_w"]), p["bn3"])
        return h + v                    # use_residual path (Cin==Cout, stride==1)

    ref = reference(x, params)

    assert y.shape == (N, Cout, H, W) and y.dtype == x.dtype
    err = float(jnp.max(jnp.abs(y - ref)))
    assert jnp.allclose(y, ref, atol=2e-2, rtol=2e-2), f"max abs err = {err}"
    print("KERNEL_OK")
</pallas_src>

<mosaic_0001>
module attributes {stable_mosaic.version = 11 : i64} {
  func.func @_fused_ir_kernel(%arg0: i32, %arg1: memref<1x4x256xf32, #tpu.memory_space<vmem>>, %arg2: memref<24x4xf32, #tpu.memory_space<vmem>>, %arg3: memref<24x1xf32, #tpu.memory_space<vmem>>, %arg4: memref<24x9xf32, #tpu.memory_space<vmem>>, %arg5: memref<24x1xf32, #tpu.memory_space<vmem>>, %arg6: memref<4x24xf32, #tpu.memory_space<vmem>>, %arg7: memref<4x1xf32, #tpu.memory_space<vmem>>, %arg8: memref<2x256xf32, #tpu.memory_space<vmem>>, %arg9: memref<1x4x256xf32, #tpu.memory_space<vmem>>, %arg10: memref<24x290xf32, #tpu.memory_space<vmem>>) attributes {dimension_semantics = [#tpu.dimension_semantics<parallel>], iteration_bounds = array<i64: 2>, scalar_prefetch = 0 : i64, scratch_operands = 1 : i64, tpu.core_type = #tpu.core_type<tc>, window_params = [{transform_indices = @transform_0, window_bounds = array<i64: 1, 4, 256>}, {pipeline_mode = #tpu.pipeline_mode<synchronous>, transform_indices = @transform_1, window_bounds = array<i64: 24, 4>}, {pipeline_mode = #tpu.pipeline_mode<synchronous>, transform_indices = @transform_2, window_bounds = array<i64: 24, 1>}, {pipeline_mode = #tpu.pipeline_mode<synchronous>, transform_indices = @transform_3, window_bounds = array<i64: 24, 9>}, {pipeline_mode = #tpu.pipeline_mode<synchronous>, transform_indices = @transform_4, window_bounds = array<i64: 24, 1>}, {pipeline_mode = #tpu.pipeline_mode<synchronous>, transform_indices = @transform_5, window_bounds = array<i64: 4, 24>}, {pipeline_mode = #tpu.pipeline_mode<synchronous>, transform_indices = @transform_6, window_bounds = array<i64: 4, 1>}, {pipeline_mode = #tpu.pipeline_mode<synchronous>, transform_indices = @transform_7, window_bounds = array<i64: 2, 256>}, {transform_indices = @transform_8, window_bounds = array<i64: 1, 4, 256>}]} {
    %c0 = arith.constant 0 : index
    %c0_0 = arith.constant 0 : index
    %c0_1 = arith.constant 0 : index
    %0 = vector.load %arg1[%c0, %c0_0, %c0_1] : memref<1x4x256xf32, #tpu.memory_space<vmem>>, vector<1x4x256xf32>
    %1 = vector.shape_cast %0 : vector<1x4x256xf32> to vector<4x256xf32>
    %c0_2 = arith.constant 0 : index
    %c0_3 = arith.constant 0 : index
    %2 = vector.load %arg2[%c0_2, %c0_3] : memref<24x4xf32, #tpu.memory_space<vmem>>, vector<24x4xf32>
    %cst = arith.constant dense<0.000000e+00> : vector<24x256xf32>
    %3 = tpu.matmul %2, %1, %cst {dimension_numbers = #tpu.dot_dimension_numbers<[1], [0], [0], [1], [0, 0, 1, 1], [], []>} : vector<24x4xf32>, vector<4x256xf32>, vector<24x256xf32> -> vector<24x256xf32>
    %c0_4 = arith.constant 0 : index
    %c0_5 = arith.constant 0 : index
    %4 = vector.load %arg3[%c0_4, %c0_5] : memref<24x1xf32, #tpu.memory_space<vmem>>, vector<24x1xf32>
    %5 = vector.broadcast %4 : vector<24x1xf32> to vector<24x256xf32>
    %6 = arith.addf %3, %5 : vector<24x256xf32>
    %7 = arith.negf %6 : vector<24x256xf32>
    %8 = math.exp %7 : vector<24x256xf32>
    %cst_6 = arith.constant 1.000000e+00 : f32
    %9 = vector.broadcast %cst_6 : f32 to vector<24x256xf32>
    %10 = arith.addf %9, %8 : vector<24x256xf32>
    %11 = arith.divf %9, %10 : vector<24x256xf32>
    %12 = arith.mulf %6, %11 : vector<24x256xf32>
    %cst_7 = arith.constant 0.000000e+00 : f32
    %13 = vector.broadcast %cst_7 : f32 to vector<24x290xf32>
    %c0_8 = arith.constant 0 : index
    %c0_9 = arith.constant 0 : index
    %14 = vector.load %arg10[%c0_8, %c0_9] : memref<24x290xf32, #tpu.memory_space<vmem>>, vector<24x290xf32>
    tpu.vector_store %arg10[%c0_8, %c0_9], %13 {strides = array<i32>} : memref<24x290xf32, #tpu.memory_space<vmem>>, vector<24x290xf32>,
    %c0_10 = arith.constant 0 : index
    %c17 = arith.constant 17 : index
    %15 = vector.load %arg10[%c0_10, %c17] : memref<24x290xf32, #tpu.memory_space<vmem>>, vector<24x256xf32>
    tpu.vector_store %arg10[%c0_10, %c17], %12 {strides = array<i32>} : memref<24x290xf32, #tpu.memory_space<vmem>>, vector<24x256xf32>,
    %c0_11 = arith.constant 0 : index
    %c0_12 = arith.constant 0 : index
    %16 = vector.load %arg8[%c0_11, %c0_12] : memref<2x256xf32, #tpu.memory_space<vmem>>, vector<1x256xf32>
    %c1 = arith.constant 1 : index
    %c0_13 = arith.constant 0 : index
    %17 = vector.load %arg8[%c1, %c0_13] : memref<2x256xf32, #tpu.memory_space<vmem>>, vector<1x256xf32>
    %cst_14 = arith.constant 0.000000e+00 : f32
    %18 = vector.broadcast %cst_14 : f32 to vector<24x256xf32>
    %c0_15 = arith.constant 0 : index
    %c0_16 = arith.constant 0 : index
    %19 = vector.load %arg10[%c0_15, %c0_16] : memref<24x290xf32, #tpu.memory_space<vmem>>, vector<24x256xf32>
    %c0_17 = arith.constant 0 : index
    %c0_18 = arith.constant 0 : index
    %20 = vector.load %arg4[%c0_17, %c0_18] : memref<24x9xf32, #tpu.memory_space<vmem>>, vector<24x1xf32>
    %21 = vector.broadcast %20 : vector<24x1xf32> to vector<24x256xf32>
    %22 = arith.mulf %19, %21 : vector<24x256xf32>
    %23 = vector.broadcast %16 : vector<1x256xf32> to vector<24x256xf32>
    %24 = arith.mulf %22, %23 : vector<24x256xf32>
    %25 = arith.addf %18, %24 : vector<24x256xf32>
    %c0_19 = arith.constant 0 : index
    %c1_20 = arith.constant 1 : index
    %26 = vector.load %arg10[%c0_19, %c1_20] : memref<24x290xf32, #tpu.memory_space<vmem>>, vector<24x256xf32>
    %c0_21 = arith.constant 0 : index
    %c1_22 = arith.constant 1 : index
    %27 = vector.load %arg4[%c0_21, %c1_22] : memref<24x9xf32, #tpu.memory_space<vmem>>, vector<24x1xf32>
    %28 = vector.broadcast %27 : vector<24x1xf32> to vector<24x256xf32>
    %29 = arith.mulf %26, %28 : vector<24x256xf32>
    %30 = arith.addf %25, %29 : vector<24x256xf32>
    %c0_23 = arith.constant 0 : index
    %c2 = arith.constant 2 : index
    %31 = vector.load %arg10[%c0_23, %c2] : memref<24x290xf32, #tpu.memory_space<vmem>>, vector<24x256xf32>
    %c0_24 = arith.constant 0 : index
    %c2_25 = arith.constant 2 : index
    %32 = vector.load %arg4[%c0_24, %c2_25] : memref<24x9xf32, #tpu.memory_space<vmem>>, vector<24x1xf32>
    %33 = vector.broadcast %32 : vector<24x1xf32> to vector<24x256xf32>
    %34 = arith.mulf %31, %33 : vector<24x256xf32>
    %35 = vector.broadcast %17 : vector<1x256xf32> to vector<24x256xf32>
    %36 = arith.mulf %34, %35 : vector<24x256xf32>
    %37 = arith.addf %30, %36 : vector<24x256xf32>
    %c0_26 = arith.constant 0 : index
    %c16 = arith.constant 16 : index
    %38 = vector.load %arg10[%c0_26, %c16] : memref<24x290xf32, #tpu.memory_space<vmem>>, vector<24x256xf32>
    %c0_27 = arith.constant 0 : index
    %c3 = arith.constant 3 : index
    %39 = vector.load %arg4[%c0_27, %c3] : memref<24x9xf32, #tpu.memory_space<vmem>>, vector<24x1xf32>
    %40 = vector.broadcast %39 : vector<24x1xf32> to vector<24x256xf32>
    %41 = arith.mulf %38, %40 : vector<24x256xf32>
    %42 = vector.broadcast %16 : vector<1x256xf32> to vector<24x256xf32>
    %43 = arith.mulf %41, %42 : vector<24x256xf32>
    %44 = arith.addf %37, %43 : vector<24x256xf32>
    %c0_28 = arith.constant 0 : index
    %c17_29 = arith.constant 17 : index
    %45 = vector.load %arg10[%c0_28, %c17_29] : memref<24x290xf32, #tpu.memory_space<vmem>>, vector<24x256xf32>
    %c0_30 = arith.constant 0 : index
    %c4 = arith.constant 4 : index
    %46 = vector.load %arg4[%c0_30, %c4] : memref<24x9xf32, #tpu.memory_space<vmem>>, vector<24x1xf32>
    %47 = vector.broadcast %46 : vector<24x1xf32> to vector<24x256xf32>
    %48 = arith.mulf %45, %47 : vector<24x256xf32>
    %49 = arith.addf %44, %48 : vector<24x256xf32>
    %c0_31 = arith.constant 0 : index
    %c18 = arith.constant 18 : index
    %50 = vector.load %arg10[%c0_31, %c18] : memref<24x290xf32, #tpu.memory_space<vmem>>, vector<24x256xf32>
    %c0_32 = arith.constant 0 : index
    %c5 = arith.constant 5 : index
    %51 = vector.load %arg4[%c0_32, %c5] : memref<24x9xf32, #tpu.memory_space<vmem>>, vector<24x1xf32>
    %52 = vector.broadcast %51 : vector<24x1xf32> to vector<24x256xf32>
    %53 = arith.mulf %50, %52 : vector<24x256xf32>
    %54 = vector.broadcast %17 : vector<1x256xf32> to vector<24x256xf32>
    %55 = arith.mulf %53, %54 : vector<24x256xf32>
    %56 = arith.addf %49, %55 : vector<24x256xf32>
    %c0_33 = arith.constant 0 : index
    %c32 = arith.constant 32 : index
    %57 = vector.load %arg10[%c0_33, %c32] : memref<24x290xf32, #tpu.memory_space<vmem>>, vector<24x256xf32>
    %c0_34 = arith.constant 0 : index
    %c6 = arith.constant 6 : index
    %58 = vector.load %arg4[%c0_34, %c6] : memref<24x9xf32, #tpu.memory_space<vmem>>, vector<24x1xf32>
    %59 = vector.broadcast %58 : vector<24x1xf32> to vector<24x256xf32>
    %60 = arith.mulf %57, %59 : vector<24x256xf32>
    %61 = vector.broadcast %16 : vector<1x256xf32> to vector<24x256xf32>
    %62 = arith.mulf %60, %61 : vector<24x256xf32>
    %63 = arith.addf %56, %62 : vector<24x256xf32>
    %c0_35 = arith.constant 0 : index
    %c33 = arith.constant 33 : index
    %64 = vector.load %arg10[%c0_35, %c33] : memref<24x290xf32, #tpu.memory_space<vmem>>, vector<24x256xf32>
    %c0_36 = arith.constant 0 : index
    %c7 = arith.constant 7 : index
    %65 = vector.load %arg4[%c0_36, %c7] : memref<24x9xf32, #tpu.memory_space<vmem>>, vector<24x1xf32>
    %66 = vector.broadcast %65 : vector<24x1xf32> to vector<24x256xf32>
    %67 = arith.mulf %64, %66 : vector<24x256xf32>
    %68 = arith.addf %63, %67 : vector<24x256xf32>
    %c0_37 = arith.constant 0 : index
    %c34 = arith.constant 34 : index
    %69 = vector.load %arg10[%c0_37, %c34] : memref<24x290xf32, #tpu.memory_space<vmem>>, vector<24x256xf32>
    %c0_38 = arith.constant 0 : index
    %c8 = arith.constant 8 : index
    %70 = vector.load %arg4[%c0_38, %c8] : memref<24x9xf32, #tpu.memory_space<vmem>>, vector<24x1xf32>
    %71 = vector.broadcast %70 : vector<24x1xf32> to vector<24x256xf32>
    %72 = arith.mulf %69, %71 : vector<24x256xf32>
    %73 = vector.broadcast %17 : vector<1x256xf32> to vector<24x256xf32>
    %74 = arith.mulf %72, %73 : vector<24x256xf32>
    %75 = arith.addf %68, %74 : vector<24x256xf32>
    %c0_39 = arith.constant 0 : index
    %c0_40 = arith.constant 0 : index
    %76 = vector.load %arg5[%c0_39, %c0_40] : memref<24x1xf32, #tpu.memory_space<vmem>>, vector<24x1xf32>
    %77 = vector.broadcast %76 : vector<24x1xf32> to vector<24x256xf32>
    %78 = arith.addf %75, %77 : vector<24x256xf32>
    %79 = arith.negf %78 : vector<24x256xf32>
    %80 = math.exp %79 : vector<24x256xf32>
    %cst_41 = arith.constant 1.000000e+00 : f32
    %81 = vector.broadcast %cst_41 : f32 to vector<24x256xf32>
    %82 = arith.addf %81, %80 : vector<24x256xf32>
    %83 = arith.divf %81, %82 : vector<24x256xf32>
    %84 = arith.mulf %78, %83 : vector<24x256xf32>
    %c0_42 = arith.constant 0 : index
    %c0_43 = arith.constant 0 : index
    %85 = vector.load %arg6[%c0_42, %c0_43] : memref<4x24xf32, #tpu.memory_space<vmem>>, vector<4x24xf32>
    %cst_44 = arith.constant dense<0.000000e+00> : vector<4x256xf32>
    %86 = tpu.matmul %85, %84, %cst_44 {dimension_numbers = #tpu.dot_dimension_numbers<[1], [0], [0], [1], [0, 0, 1, 1], [], []>} : vector<4x24xf32>, vector<24x256xf32>, vector<4x256xf32> -> vector<4x256xf32>
    %c0_45 = arith.constant 0 : index
    %c0_46 = arith.constant 0 : index
    %87 = vector.load %arg7[%c0_45, %c0_46] : memref<4x1xf32, #tpu.memory_space<vmem>>, vector<4x1xf32>
    %88 = vector.broadcast %87 : vector<4x1xf32> to vector<4x256xf32>
    %89 = arith.addf %86, %88 : vector<4x256xf32>
    %90 = arith.addf %89, %1 : vector<4x256xf32>
    %c0_47 = arith.constant 0 : index
    %c0_48 = arith.constant 0 : index
    %c0_49 = arith.constant 0 : index
    %91 = vector.load %arg9[%c0_47, %c0_48, %c0_49] : memref<1x4x256xf32, #tpu.memory_space<vmem>>, vector<1x4x256xf32>
    %92 = vector.shape_cast %91 : vector<1x4x256xf32> to vector<4x256xf32>
    %93 = vector.shape_cast %90 : vector<4x256xf32> to vector<1x4x256xf32>
    tpu.vector_store %arg9[%c0_47, %c0_48, %c0_49], %93 {strides = array<i32>} : memref<1x4x256xf32, #tpu.memory_space<vmem>>, vector<1x4x256xf32>,
    return
  }
  func.func @transform_0(%arg0: i32) -> (i32, i32, i32) {
    %c0_i32 = arith.constant 0 : i32
    %c0_i32_0 = arith.constant 0 : i32
    %c0_i32_1 = arith.constant 0 : i32
    return %arg0, %c0_i32, %c0_i32_0 : i32, i32, i32
  }
  func.func @transform_1(%arg0: i32) -> (i32, i32) {
    %c0_i32 = arith.constant 0 : i32
    %c0_i32_0 = arith.constant 0 : i32
    %c0_i32_1 = arith.constant 0 : i32
    return %c0_i32, %c0_i32_0 : i32, i32
  }
  func.func @transform_2(%arg0: i32) -> (i32, i32) {
    %c0_i32 = arith.constant 0 : i32
    %c0_i32_0 = arith.constant 0 : i32
    %c0_i32_1 = arith.constant 0 : i32
    return %c0_i32, %c0_i32_0 : i32, i32
  }
  func.func @transform_3(%arg0: i32) -> (i32, i32) {
    %c0_i32 = arith.constant 0 : i32
    %c0_i32_0 = arith.constant 0 : i32
    %c0_i32_1 = arith.constant 0 : i32
    return %c0_i32, %c0_i32_0 : i32, i32
  }
  func.func @transform_4(%arg0: i32) -> (i32, i32) {
    %c0_i32 = arith.constant 0 : i32
    %c0_i32_0 = arith.constant 0 : i32
    %c0_i32_1 = arith.constant 0 : i32
    return %c0_i32, %c0_i32_0 : i32, i32
  }
  func.func @transform_5(%arg0: i32) -> (i32, i32) {
    %c0_i32 = arith.constant 0 : i32
    %c0_i32_0 = arith.constant 0 : i32
    %c0_i32_1 = arith.constant 0 : i32
    return %c0_i32, %c0_i32_0 : i32, i32
  }
  func.func @transform_6(%arg0: i32) -> (i32, i32) {
    %c0_i32 = arith.constant 0 : i32
    %c0_i32_0 = arith.constant 0 : i32
    %c0_i32_1 = arith.constant 0 : i32
    return %c0_i32, %c0_i32_0 : i32, i32
  }
  func.func @transform_7(%arg0: i32) -> (i32, i32) {
    %c0_i32 = arith.constant 0 : i32
    %c0_i32_0 = arith.constant 0 : i32
    %c0_i32_1 = arith.constant 0 : i32
    return %c0_i32, %c0_i32_0 : i32, i32
  }
  func.func @transform_8(%arg0: i32) -> (i32, i32, i32) {
    %c0_i32 = arith.constant 0 : i32
    %c0_i32_0 = arith.constant 0 : i32
    %c0_i32_1 = arith.constant 0 : i32
    return %arg0, %c0_i32, %c0_i32_0 : i32, i32, i32
  }
}

</mosaic_0001>

<bundles_post_ra>
// kernel: inverted_residual.1
= control target key start
LH: loop header
LB: loop body
LE: loop exit
PB: predicated region body
PF: predicated region fallthrough
CT: control target
= control target key end

     0   :  { %s1650_s27 = smov 0   ;;  %s2277_s0 = inlined_call_operand.vmem [shape: f32[2,4,256], index: 0, kind: input, shape index: {}]   ;;  %s2278_s1 = inlined_call_operand.vmem [shape: f32[24,4], index: 1, kind: input, shape index: {}]   ;;  %s2279_s2 = inlined_call_operand.vmem [shape: f32[24,1], index: 2, kind: input, shape index: {}]   ;;  %s2280_s3 = inlined_call_operand.vmem [shape: f32[24,9], index: 3, kind: input, shape index: {}]   ;;  %s2281_s4 = inlined_call_operand.vmem [shape: f32[24,1], index: 4, kind: input, shape index: {}]   ;;  %s2282_s5 = inlined_call_operand.vmem [shape: f32[4,24], index: 5, kind: input, shape index: {}]   ;;  %s2283_s6 = inlined_call_operand.vmem [shape: f32[4,1], index: 6, kind: input, shape index: {}]   ;;  %s2284_s7 = inlined_call_operand.vmem [shape: f32[2,256], index: 7, kind: input, shape index: {}]   ;;  %s2285_s8 = inlined_call_operand.vmem [shape: f32[2,4,256], index: 8, kind: output, shape index: {}]  }
   0x1 LB: > { %s1431_s28 = sadd.s32 4294967295, %s1579_s27   ;;  %p1435_p0 = scmp.ge.s32.totalorder %s1579_s27, 1  ;;  %s1579_s27 = sphi %s1650_s27, %s18_s27  }
   0x2   : > { %p262_p1 = scmp.lt.s32.totalorder %s1579_s27, 3 }
   0x4   : > { %p263_p2 = pnand %p1435_p0, %p262_p1 }
   0x6   : > { %266 = sbr.rel (%p263_p2) target bundleno = 904 (0x388), region = 52 }
   0xd   : > { %p296_p3 = scmp.lt.s32.totalorder %s1431_s28, 1  ;;  %v1581_v0 = vmov 0.0   ;;  %v310_v1 = vld [vmem:[%s2279_s2] sm:$0xff]  ;;  %v1582_v2 = vmov 0   ;;  %v312_v3 = vld [vmem:[%s2279_s2 + $0x10] sm:$0xff]  ;;  %v311_v4 = vld [vmem:[%s2279_s2 + $0x8] sm:$0xff]  ;;  %v555_v10 = vlaneseq }
   0xe   : > { %409 = vmatprep.mubr.f32.mxu0 %v1581_v0  ;;  %470 = vst [vmem:[#allocation2] sm:$0xff] %v1581_v0  ;;  %474 = vst [vmem:[#allocation2 + $0x18] sm:$0xff] %v1581_v0  ;;  %1361 = vmatprep.mubr.f32.mxu1 %v1581_v0  ;;  %v1687_v5 = vld [vmem:[%s2280_s3] sm:$0xff]  ;;  %vm340_vm0 = vcmask 1043456   ;;  %v1583_v8 = vmov 1   ;;  %vm330_vm1 = vcmask 31744  }
   0xf   : > { %477 = vst [vmem:[#allocation2 + $0x30] sm:$0xff] %v1581_v0  ;;  %s2290_s28 = smov (!%p296_p3, %s1431_s28), 1  ;;  %1499 = vset.pattern.permute.xlu0 %v1582_v2  ;;  %1500 = vset.pattern.permute.xlu1 %v1582_v2  ;;  %v307_v9 = vld [vmem:[%s2278_s1] sm:$0xff]  ;;  %v308_v11 = vld [vmem:[%s2278_s1 + $0x8] sm:$0xff]  ;;  %v1584_v12 = vmov 2   ;;  %v556_v14 = vshrl.u32 %v555_v10, 7 }
  0x10   : > { %315 = vperm.xlu0 %1499, %v310_v1   ;;  %325 = vperm.xlu1 %1500, %v312_v3   ;;  %s1461_s11 = sshll.u32 %s2290_s28, 3  ;;  %v1705_v13 = vld [vmem:[%s2280_s3 + $0x8] sm:$0xff]  ;;  %v309_v15 = vld [vmem:[%s2278_s1 + $0x10] sm:$0xff]  ;;  %v1585_v16 = vmov 3   ;;  %s1586_s12 = smov 2   ;;  %v1587_v21 = vmov 6  }
  0x11   : > { %s1682_s16 = scalar_lea.vmem %s2277_s0, %s1461_s11  ;;  %v561_v17 = vsub.s32 1, %v556_v14  ;;  %v1451_v18 = vld [vmem:[%s2284_s7 + $0x1] ss:$2 sm:$0x3]  ;;  %v1724_v19 = vld [vmem:[%s2280_s3 + $0x10] sm:$0xff]  ;;  %v1588_v22 = vmov 4   ;;  %s305_s23 = scalar_lea.vmem %s2285_s8, %s1461_s11 }
  0x12   : > { %v306_v6 = vld [vmem:[%s1682_s16] sm:$0xff]  ;;  %v1589_v24 = vmov 5   ;;  %v557_v26 = vsub.s32 0, %v556_v14  ;;  %s1590_s15 = smov 16   ;;  %v1591_v28 = vmov 8   ;;  %s1592_s17 = smov 18  }
  0x13   : > { %v1690_v7 = vcombine.high %v306_v6, %v306_v6  ;;  %v682_v20 = vrot.slane %v1451_v18, %v561_v17  ;;  %v521_v23 = vld [vmem:[%s2284_s7] ss:$2 sm:$0x3]  ;;  %v1593_v30 = vmov 7   ;;  %s1594_s18 = smov 32   ;;  %s1595_s19 = smov 34  }
  0x14   : > { %320 = vperm.xlu0 %1499, %v311_v4   ;;  %1501 = vset.pattern.permute.xlu1 %v1583_v8  ;;  %v1734_v25 = vrot.slane %v521_v23, %v561_v17  ;;  %v678_v27 = vrot.slane %v1451_v18, %v557_v26  ;;  %v1742_v29 = vrot.slane %v521_v23, %v557_v26  ;;  %v1221_v31 = vld [vmem:[%s2281_s4 + $0x8] sm:$0xff]  ;;  %v1220_v32 = vld [vmem:[%s2281_s4] sm:$0xff]  ;;  %v1222_v33 = vld [vmem:[%s2281_s4 + $0x10] sm:$0xff]  ;;  %vm472_vm2 = vcmask 277504   ;;  %s1596_s26 = smov 17   ;;  %s1597_s29 = smov 111  }
  0x15   : > { %2287 = vst [vmem:[#allocation3_spill] sm:$0xff] %v1690_v7  ;;  %587 = vperm.xlu1 %1501, %v1687_v5   ;;  %1440 = vmatprep.subr.msk.mxu0 %vm340_vm0, %v1690_v7  ;;  %473 = vst.msk [vmem:[#allocation2 + $0x10] sm:$0xff] %vm472_vm2, %v1581_v0  ;;  %vm511_vm3 = vcmask 1047688   ;;  %vm498_vm4 = vcmask 138240   ;;  %s1598_s30 = smov 127   ;;  %s1599_s9 = smov 95  }
  0x16   : > { %1441 = vmatpush1.msk.msra.mxu0 %vm340_vm0, %v306_v6  ;;  %476 = vst.msk [vmem:[#allocation2 + $0x28] sm:$0xff] %vm472_vm2, %v1581_v0  ;;  %479 = vst.msk [vmem:[#allocation2 + $0x40] sm:$0xff] %vm472_vm2, %v1581_v0  ;;  %s1600_s10 = smov 96   ;;  %vm687_vm5 = vcmask 15360   ;;  %vm772_vm6 = vcmask 130048   ;;  %vm1009_vm7 = vcmask 261120  }
  0x17   : > { %1442 = vmatmul.mubr.msk.f32.vlgmr.msra.gmra.mrb[0].mxu0 %vm330_vm1, %v307_v9  ;;  %vm924_vm8 = vcmask 146432   ;;  %s1602_s13 = smov 94   ;;  %s1603_s14 = smov 112   ;;  %vm634_vm9 = vcmask 1039360   ;;  %vm1117_vm10 = vcmask 777216   ;;  %vm880_vm11 = vcmask 908288  }
  0x18   : > { %1502 = vset.pattern.permute.xlu0 %v1583_v8  ;;  %415 = vmatprep.mubr.f32.mxu0 %v1581_v0  ;;  %vm728_vm12 = vcmask 1031168   ;;  %vm813_vm13 = vcmask 916480   ;;  %vm965_vm14 = vcmask 900096   ;;  %vm1050_vm15 = vcmask 785408  }
  0x19   : > { %1503 = vset.pattern.permute.xlu1 %v1584_v12  ;;  %591 = vperm.xlu0 %1502, %v1705_v13   ;;  %vm1201_vm0 = vcmask 769024  }
  0x1a   : > { %654 = vperm.xlu1 %1503, %v1687_v5  }
  0x1b   : > { %1443 = vmatmul.mubr.msk.f32.gmra.mrb[2].mxu0 %vm330_vm1, %v308_v11 }
  0x1c   : > { %421 = vmatprep.mubr.f32.mxu0 %v1581_v0 }
  0x1d   : > { %1504 = vset.pattern.permute.xlu0 %v1585_v16 }
  0x1e   : > { %658 = vperm.xlu1 %1503, %v1705_v13   ;;  %748 = vperm.xlu0 %1504, %v1687_v5  }
  0x1f   : > { %1444 = vmatmul.mubr.msk.f32.gmra.mrb[4].mxu0 %vm330_vm1, %v309_v15  ;;  %vm1293_vm1 = vcmask 195584  }
  0x22   : > { %1505 = vset.pattern.permute.xlu1 %v1585_v16  ;;  %1507 = vset.pattern.permute.xlu0 %v1584_v12 }
  0x23   : > { %752 = vperm.xlu1 %1505, %v1705_v13   ;;  %662 = vperm.xlu0 %1507, %v1724_v19  }
  0x27   : > { %1506 = vset.pattern.permute.xlu1 %v1583_v8  ;;  %685 = vrot.lane.b32.xlu0 %v682_v20, %s1586_s12 }
  0x28   : > { %595 = vperm.xlu1 %1506, %v1724_v19   ;;  %1511 = vset.pattern.permute.xlu0 %v1587_v21 }
  0x2b   : > { %985 = vperm.xlu0 %1511, %v1687_v5  }
  0x2c   : > { %1508 = vset.pattern.permute.xlu1 %v1588_v22 }
  0x2d   : > { %833 = vperm.xlu1 %1508, %v1687_v5  }
  0x2f   : > { %1512 = vset.pattern.permute.xlu0 %v1589_v24 }
  0x30   : > { %900 = vperm.xlu0 %1512, %v1687_v5  }
  0x31   : > { %837 = vperm.xlu1 %1508, %v1705_v13  }
  0x34   : > { %770 = vrot.lane.b32.xlu0 %v1734_v25, %s1590_s15 }
  0x35   : > { %1509 = vset.pattern.permute.xlu1 %v1589_v24 }
  0x36   : > { %904 = vperm.xlu1 %1509, %v1705_v13  }
  0x38   : > { %908 = vperm.xlu0 %1512, %v1724_v19  }
  0x3a   : > { %683 = vrot.lane.b32.xlu1 %v678_v27, %s1586_s12  ;;  %s1601_s12 = smov 126  }
  0x3b   : > { %1510 = vset.pattern.permute.xlu1 %v1585_v16 }
  0x3c   : > { %1516 = vset.pattern.permute.xlu0 %v1591_v28 }
  0x3d   : > { %1137 = vperm.xlu0 %1516, %v1687_v5  }
  0x3e   : > { %756 = vperm.xlu1 %1510, %v1724_v19  }
  0x41   : > { %922 = vrot.lane.b32.xlu0 %v682_v20, %s1592_s17 }
  0x42   : > { %1513 = vset.pattern.permute.xlu1 %v1587_v21  ;;  %1519 = vset.pattern.permute.xlu0 %v1593_v30 }
  0x43   : > { %989 = vperm.xlu1 %1513, %v1705_v13  }
  0x45   : > { %1005 = vrot.lane.b32.xlu0 %v1742_v29, %s1594_s18 }
  0x47   : > { %768 = vrot.lane.b32.xlu1 %v1742_v29, %s1590_s15  ;;  %s1604_s15 = smov 110  }
  0x48   : > { %1514 = vset.pattern.permute.xlu1 %v1588_v22 }
  0x49   : > { %1078 = vperm.xlu0 %1519, %v1724_v19  }
  0x4b   : > { %841 = vperm.xlu1 %1514, %v1724_v19  }
  0x4d   : > { %1159 = vrot.lane.b32.xlu0 %v682_v20, %s1595_s19 }
  0x4e   : > { %1522 = vset.pattern.permute.xlu0 %v1582_v2 }
  0x4f   : > { %1515 = vset.pattern.permute.xlu1 %v1593_v30 }
  0x50   : > { %1070 = vperm.xlu1 %1515, %v1687_v5  }
  0x51   : > { %540 = vperm.xlu0 %1522, %v1705_v13  }
  0x54   : > { %1074 = vperm.xlu1 %1515, %v1705_v13  }
  0x55   : > { %1230 = vperm.xlu0 %1522, %v1221_v31  }
  0x58   : > { %1517 = vset.pattern.permute.xlu1 %v1591_v28 }
  0x59   : > { %1141 = vperm.xlu1 %1517, %v1705_v13   ;;  %1235 = vperm.xlu0 %1522, %v1222_v33  }
  0x5d   : > { %920 = vrot.lane.b32.xlu1 %v678_v27, %s1592_s17 }
  0x5e   : > { %1518 = vset.pattern.permute.xlu1 %v1587_v21 }
  0x61   : > { %993 = vperm.xlu1 %1518, %v1724_v19  }
  0x65   : > { %1007 = vrot.lane.b32.xlu1 %v1734_v25, %s1594_s18 }
  0x66   : > { %1520 = vset.pattern.permute.xlu1 %v1591_v28 }
  0x69   : > { %1145 = vperm.xlu1 %1520, %v1724_v19  }
  0x6d   : > { %1157 = vrot.lane.b32.xlu1 %v678_v27, %s1595_s19 }
  0x6e   : > { %1521 = vset.pattern.permute.xlu1 %v1582_v2 }
  0x71   : > { %535 = vperm.xlu1 %1521, %v1687_v5  }
  0x75   : > { %545 = vperm.xlu1 %1521, %v1724_v19  }
  0x79   : > { %1225 = vperm.xlu1 %1521, %v1220_v32  }
  0x8f   : > { %v316_v34 = vpop.permute.xlu0 %315  ;;  %v326_v40 = vpop.permute.xlu1 %325 }
  0x93   : > { %v321_v41 = vpop.permute.xlu0 %320 }
  0x94   : > { %v1775_v48 = vpop.permute.xlu1 %587 }
  0x98   : > { %v1793_v26 = vpop.permute.xlu0 %591 }
  0x99   : > { %v1777_v56 = vpop.permute.xlu1 %654 }
  0x9d   : > { %v1779_v62 = vpop.permute.xlu1 %658  ;;  %v1797_v28 = vpop.permute.xlu0 %748 }
  0xa2   : > { %v1781_v6 = vpop.permute.xlu1 %752  ;;  %v1801_v31 = vpop.permute.xlu0 %662 }
  0xa6   : > { %v1805_v33 = vpop.permute.xlu0 %685 }
  0xa7   : > { %v1783_v12 = vpop.permute.xlu1 %595 }
  0xac   : > { %v1785_v20 = vpop.permute.xlu1 %833 }
  0xb0   : > { %v1787_v22 = vpop.permute.xlu1 %837 }
  0xb5   : > { %v1789_v23 = vpop.permute.xlu1 %904 }
  0xb9   : > { %v1791_v24 = vpop.permute.xlu1 %683 }
  0xbd   : > { %v1795_v27 = vpop.permute.xlu1 %756 }
  0xc2   : > { %v1799_v30 = vpop.permute.xlu1 %989 }
  0xc6   : > { %v1803_v32 = vpop.permute.xlu1 %768 }
  0xea   : > { %v411_v35 = vpop.f32.mrb[0].mxu0 }
  0xeb   : > { %v412_v36 = vadd.f32 %v411_v35, %v316_v34  ;;  %v413_v37 = vpop.f32.mrb[1].mxu0  ;;  %v1809_v35 = vpop.permute.xlu0 %985 }
  0xec   : > { %v414_v38 = vadd.f32 %v413_v37, %v316_v34  ;;  %v1807_v34 = vpop.permute.xlu1 %841 }
  0xed   : > { %v1445_v39 = vmul.f32 -1.442695, %v412_v36 }
  0xee   : > { %v1446_v42 = vmul.f32 -1.442695, %v414_v38  ;;  %v417_v43 = vpop.f32.mrb[2].mxu0 }
  0xef   : > { %1524 = vpow2.f32 %v1445_v39  ;;  %v418_v44 = vadd.f32 %v417_v43, %v321_v41  ;;  %v419_v45 = vpop.f32.mrb[3].mxu0  ;;  %v1813_v37 = vpop.permute.xlu0 %900 }
  0xf0   : > { %1526 = vpow2.f32 %v1446_v42  ;;  %v420_v46 = vadd.f32 %v419_v45, %v321_v41 }
  0xf1   : > { %v1447_v47 = vmul.f32 -1.442695, %v418_v44 }
  0xf2   : > { %v1448_v49 = vmul.f32 -1.442695, %v420_v46  ;;  %v423_v50 = vpop.f32.mrb[4].mxu0 }
  0xf3   : > { %1528 = vpow2.f32 %v1447_v47  ;;  %v424_v51 = vadd.f32 %v423_v50, %v326_v40  ;;  %v425_v52 = vpop.f32.mrb[5].mxu0  ;;  %v1817_v39 = vpop.permute.xlu0 %770 }
  0xf4   : > { %1530 = vpow2.f32 %v1448_v49  ;;  %v426_v53 = vadd.f32 %v425_v52, %v326_v40 }
  0xf5   : > { %v1449_v54 = vmul.f32 -1.442695, %v424_v51 }
  0xf6   : > { %v1450_v55 = vmul.f32 -1.442695, %v426_v53 }
  0xf7   : > { %1532 = vpow2.f32 %v1449_v54  ;;  %v1821_v41 = vpop.permute.xlu0 %908 }
  0xf8   : > { %1534 = vpow2.f32 %v1450_v55 }
  0xf9   : > { %v1525_v57 = vpop.eup %1524 }
  0xfa   : > { %v1527_v58 = vpop.eup %1526  ;;  %v446_v59 = vadd.f32 1.0, %v1525_v57 }
  0xfb   : > { %v447_v60 = vadd.f32 1.0, %v1527_v58  ;;  %v1825_v43 = vpop.permute.xlu0 %1137 }
  0xfc   : > { %1536 = vrcp.f32 %v446_v59 }
  0xfd   : > { %v1529_v61 = vpop.eup %1528  ;;  %1538 = vrcp.f32 %v447_v60 }
  0xfe   : > { %v1531_v63 = vpop.eup %1530  ;;  %v448_v0 = vadd.f32 1.0, %v1529_v61 }
  0xff   : > { %v449_v1 = vadd.f32 1.0, %v1531_v63  ;;  %v1829_v45 = vpop.permute.xlu0 %922 }
 0x100   : > { %1540 = vrcp.f32 %v448_v0 }
 0x101   : > { %v1533_v2 = vpop.eup %1532  ;;  %1542 = vrcp.f32 %v449_v1 }
 0x102   : > { %v1535_v3 = vpop.eup %1534  ;;  %v450_v4 = vadd.f32 1.0, %v1533_v2 }
 0x103   : > { %v451_v5 = vadd.f32 1.0, %v1535_v3 }
 0x104   : > { %1544 = vrcp.f32 %v450_v4 }
 0x105   : > { %1546 = vrcp.f32 %v451_v5 }
 0x106   : > { %v1537_v8 = vpop.eup %1536 }
 0x107   : > { %v1539_v9 = vpop.eup %1538  ;;  %v464_v10 = vmul.f32 %v1537_v8, %v412_v36  ;;  %v1811_v36 = vpop.permute.xlu1 %1070 }
 0x108   : > { %v465_v11 = vmul.f32 %v1539_v9, %v414_v38 }
 0x109   : > { %486 = vrot.lane.b32.xlu1 %v464_v10, %s1596_s26 }
 0x10a   : > { %v1541_v13 = vpop.eup %1540  ;;  %488 = vrot.lane.b32.xlu0 %v465_v11, %s1596_s26 }
 0x10b   : > { %v1543_v14 = vpop.eup %1542  ;;  %v466_v15 = vmul.f32 %v1541_v13, %v418_v44  ;;  %v1815_v38 = vpop.permute.xlu1 %1074 }
 0x10c   : > { %v467_v16 = vmul.f32 %v1543_v14, %v420_v46  ;;  %v1831_v46 = vpop.permute.xlu0 %1005 }
 0x10d   : > { %490 = vrot.lane.b32.xlu1 %v466_v15, %s1596_s26 }
 0x10e   : > { %v1545_v17 = vpop.eup %1544  ;;  %492 = vrot.lane.b32.xlu0 %v467_v16, %s1596_s26 }
 0x10f   : > { %v1547_v18 = vpop.eup %1546  ;;  %v468_v19 = vmul.f32 %v1545_v17, %v424_v51  ;;  %v1819_v40 = vpop.permute.xlu1 %1141 }
 0x110   : > { %v469_v21 = vmul.f32 %v1547_v18, %v426_v53  ;;  %v1835_v49 = vpop.permute.xlu0 %1078 }
 0x111   : > { %494 = vrot.lane.b32.xlu1 %v468_v19, %s1596_s26 }
 0x112   : > { %496 = vrot.lane.b32.xlu0 %v469_v21, %s1596_s26 }
 0x113   : > { %v1823_v42 = vpop.permute.xlu1 %920 }
 0x114   : > { %v1839_v51 = vpop.permute.xlu0 %1159 }
 0x117   : > { %v1827_v44 = vpop.permute.xlu1 %993 }
 0x118   : > { %v1843_v53 = vpop.permute.xlu0 %540 }
 0x11b   : > { %v1833_v47 = vpop.permute.xlu1 %1007 }
 0x11c   : > { %v1847_v55 = vpop.permute.xlu0 %1230 }
 0x11f   : > { %v1837_v50 = vpop.permute.xlu1 %1145 }
 0x120   : > { %v1851_v58 = vpop.permute.xlu0 %1235 }
 0x123   : > { %v1841_v52 = vpop.permute.xlu1 %1157 }
 0x127   : > { %v1845_v54 = vpop.permute.xlu1 %535 }
 0x12b   : > { %v1849_v57 = vpop.permute.xlu1 %545 }
 0x12f   : > { %v1853_v59 = vpop.permute.xlu1 %1225 }
 0x17b   : > { %v487_v60 = vpop.permute.xlu1 %486 }
 0x17c   : > { %512 = vst.msk [vmem:[#allocation2] sm:$0xff] %vm511_vm3, %v487_v60  ;;  %v489_v61 = vpop.permute.xlu0 %488 }
 0x17d   : > { %v1856_v63 = vsel %vm498_vm4, %v487_v60, %v489_v61  ;;  %514 = vst.msk [vmem:[#allocation2 + $0x10] sm:$0xff] %vm498_vm4, %v489_v61 }
 0x17e   : > { %v599_v19 = vmul.f32 %v1775_v48, %v1856_v63  ;;  %v1082_v60 = vmul.f32 %v1811_v36, %v1856_v63 }
 0x17f   : > { %v491_v0 = vpop.permute.xlu1 %490 }
 0x180   : > { %515 = vst.msk [vmem:[#allocation2 + $0x18] sm:$0xff] %vm511_vm3, %v491_v0  ;;  %v493_v1 = vpop.permute.xlu0 %492 }
 0x181   : > { %v1860_v2 = vsel %vm498_vm4, %v491_v0, %v493_v1  ;;  %517 = vst.msk [vmem:[#allocation2 + $0x28] sm:$0xff] %vm498_vm4, %v493_v1 }
 0x183   : > { %v495_v3 = vpop.permute.xlu1 %494  ;;  %v1863_v4 = vld [vmem:[#allocation2] sm:$0xff] }
 0x184   : > { %518 = vst.msk [vmem:[#allocation2 + $0x30] sm:$0xff] %vm511_vm3, %v495_v3  ;;  %v497_v5 = vpop.permute.xlu0 %496  ;;  %v844_v8 = vmul.f32 %v1785_v20, %v1863_v4  ;;  %v598_v9 = vmul.f32 %v1775_v48, %v1863_v4  ;;  %v1873_v11 = vld [vmem:[#allocation2 + $0x10] sm:$0xff]  ;;  %v1081_v14 = vmul.f32 %v1811_v36, %v1863_v4  ;;  %v996_v17 = vmul.f32 %v1809_v35, %v1863_v4 }
 0x185   : > { %v1870_v10 = vsel %vm498_vm4, %v495_v3, %v497_v5  ;;  %520 = vst.msk [vmem:[#allocation2 + $0x40] sm:$0xff] %vm498_vm4, %v497_v5  ;;  %v600_v13 = vmul.f32 %v1775_v48, %v1873_v11  ;;  %v846_v15 = vmul.f32 %v1785_v20, %v1873_v11  ;;  %v1083_v16 = vmul.f32 %v1811_v36, %v1873_v11 }
 0x186   : > { %862 = vrot.lane.b32.xlu0 %v844_v8, %s1597_s29  ;;  %616 = vrot.lane.b32.xlu1 %v598_v9, %s1598_s30  ;;  %v1014_v18 = vmul.f32 %v1831_v46, %v996_v17  ;;  %v665_v21 = vmul.f32 %v1777_v56, %v1863_v4  ;;  %v1148_v0 = vmul.f32 %v1825_v43, %v1863_v4 }
 0x187   : > { %v759_v1 = vmul.f32 %v1797_v28, %v1863_v4  ;;  %v672_v48 = vmul.f32 %v1801_v31, %v1870_v10  ;;  %v667_v5 = vmul.f32 %v1777_v56, %v1873_v11  ;;  %v1915_v8 = vsel %vm687_vm5, %v1791_v24, %v1805_v33 }
 0x188   : > { %v692_v61 = vmul.f32 %v1791_v24, %v665_v21  ;;  %v1165_v36 = vmul.f32 %v1841_v52, %v1148_v0  ;;  %v1003_v17 = vmul.f32 %v1827_v44, %v1870_v10  ;;  %v911_v21 = vmul.f32 %v1813_v37, %v1863_v4 }
 0x189   : > { %v777_v3 = vmul.f32 %v1803_v32, %v759_v1  ;;  %v1918_v9 = vmul.f32 %v1915_v8, %v672_v48  ;;  %v1952_v0 = vsel %vm472_vm2, %v1841_v52, %v1839_v51 }
 0x18a   : > { %620 = vrot.lane.b32.xlu0 %v600_v13, %s1598_s30  ;;  %1099 = vrot.lane.b32.xlu1 %v1081_v14, %s1599_s9  ;;  %v1922_v13 = vsel %vm772_vm6, %v1803_v32, %v1817_v39  ;;  %v1926_v14 = vsel %vm1009_vm7, %v1831_v46, %v1833_v47  ;;  %v929_v7 = vmul.f32 %v1823_v42, %v911_v21 }
 0x18b   : > { %v1955_v1 = vmul.f32 %v1926_v14, %v1003_v17  ;;  %v998_v17 = vmul.f32 %v1809_v35, %v1873_v11  ;;  %v666_v21 = vmul.f32 %v1777_v56, %v1856_v63 }
 0x18e   : > { %866 = vrot.lane.b32.xlu0 %v846_v15, %s1597_s29  ;;  %1103 = vrot.lane.b32.xlu1 %v1083_v16, %s1599_s9  ;;  %v845_v15 = vmul.f32 %v1785_v20, %v1856_v63  ;;  %v761_v16 = vmul.f32 %v1797_v28, %v1873_v11  ;;  %v1155_v20 = vmul.f32 %v1837_v50, %v1870_v10 }
 0x192   : > { %1032 = vrot.lane.b32.xlu0 %v1014_v18, %s1600_s10  ;;  %618 = vrot.lane.b32.xlu1 %v599_v19, %s1598_s30  ;;  %v766_v18 = vmul.f32 %v1795_v27, %v1870_v10  ;;  %v694_v19 = vmul.f32 %v1805_v33, %v667_v5  ;;  %v779_v5 = vmul.f32 %v1817_v39, %v761_v16 }
 0x193   : > { %v1150_v16 = vmul.f32 %v1825_v43, %v1873_v11 }
 0x194   : > { %v1958_v48 = vmul.f32 %v1922_v13, %v766_v18  ;;  %v913_v18 = vmul.f32 %v1813_v37, %v1873_v11 }
 0x196   : > { %1101 = vrot.lane.b32.xlu0 %v1082_v60, %s1599_s9  ;;  %710 = vrot.lane.b32.xlu1 %v692_v61, %s1601_s12  ;;  %v918_v60 = vmul.f32 %v1821_v41, %v1870_v10  ;;  %v1947_v61 = vsel %vm924_vm8, %v1823_v42, %v1829_v45 }
 0x19a   : > { %1183 = vrot.lane.b32.xlu0 %v1165_v36, %s1602_s13  ;;  %795 = vrot.lane.b32.xlu1 %v777_v3, %s1603_s14  ;;  %v1963_v36 = vmul.f32 %v1947_v61, %v918_v60  ;;  %v1966_v3 = vmul.f32 %v1952_v0, %v1155_v20  ;;  %v1167_v60 = vmul.f32 %v1839_v51, %v1150_v16 }
 0x19b   : > { %v693_v20 = vmul.f32 %v1915_v8, %v666_v21  ;;  %v1149_v16 = vmul.f32 %v1825_v43, %v1856_v63  ;;  %v582_v21 = vld [vmem:[#allocation2 + $0x28] sm:$0xff] }
 0x19e   : > { %714 = vrot.lane.b32.xlu0 %v694_v19, %s1601_s12  ;;  %864 = vrot.lane.b32.xlu1 %v845_v15, %s1597_s29  ;;  %v1016_v15 = vmul.f32 %v1833_v47, %v998_v17  ;;  %v931_v19 = vmul.f32 %v1829_v45, %v913_v18  ;;  %v912_v17 = vmul.f32 %v1813_v37, %v1856_v63 }
 0x1a0   : > { %v930_v18 = vmul.f32 %v1947_v61, %v912_v17 }
 0x1a2   : > { %799 = vrot.lane.b32.xlu0 %v779_v5, %s1603_s14  ;;  %947 = vrot.lane.b32.xlu1 %v929_v7, %s1604_s15  ;;  %v760_v7 = vmul.f32 %v1797_v28, %v1856_v63  ;;  %v1988_v5 = vld [vmem:[#allocation2 + $0x18] sm:$0xff] }
 0x1a3   : > { %v601_v56 = vmul.f32 %v1793_v26, %v1988_v5  ;;  %v847_v28 = vmul.f32 %v1787_v22, %v1988_v5  ;;  %v1084_v37 = vmul.f32 %v1815_v38, %v1988_v5  ;;  %v668_v43 = vmul.f32 %v1779_v62, %v1988_v5 }
 0x1a4   : > { %v778_v11 = vmul.f32 %v1922_v13, %v760_v7  ;;  %v849_v7 = vmul.f32 %v1787_v22, %v582_v21  ;;  %v762_v17 = vmul.f32 %v1781_v6, %v1988_v5 }
 0x1a6   : > { %1036 = vrot.lane.b32.xlu0 %v1016_v15, %s1600_s10  ;;  %951 = vrot.lane.b32.xlu1 %v931_v19, %s1604_s15  ;;  %v997_v15 = vmul.f32 %v1809_v35, %v1856_v63  ;;  %v603_v35 = vmul.f32 %v1793_v26, %v582_v21 }
 0x1a8   : > { %v1015_v19 = vmul.f32 %v1926_v14, %v997_v15  ;;  %v914_v15 = vmul.f32 %v1789_v23, %v1988_v5 }
 0x1aa   : > { %1187 = vrot.lane.b32.xlu0 %v1167_v60, %s1602_s13  ;;  %712 = vrot.lane.b32.xlu1 %v693_v20, %s1601_s12  ;;  %v1166_v60 = vmul.f32 %v1952_v0, %v1149_v16  ;;  %v1086_v20 = vmul.f32 %v1815_v38, %v582_v21  ;;  %v1151_v16 = vmul.f32 %v1819_v40, %v1988_v5 }
 0x1ae   : > { %797 = vrot.lane.b32.xlu1 %v778_v11, %s1603_s14  ;;  %622 = vrot.lane.b32.xlu0 %v601_v56, %s1598_s30  ;;  %v695_v11 = vmul.f32 %v1791_v24, %v668_v43  ;;  %v602_v56 = vmul.f32 %v1793_v26, %v1860_v2  ;;  %v932_v26 = vmul.f32 %v1823_v42, %v914_v15 }
 0x1b2   : > { %868 = vrot.lane.b32.xlu1 %v847_v28, %s1597_s29  ;;  %949 = vrot.lane.b32.xlu0 %v930_v18, %s1604_s15  ;;  %v780_v28 = vmul.f32 %v1803_v32, %v762_v17  ;;  %v848_v18 = vmul.f32 %v1787_v22, %v1860_v2  ;;  %v1085_v22 = vmul.f32 %v1815_v38, %v1860_v2 }
 0x1b6   : > { %1034 = vrot.lane.b32.xlu1 %v1015_v19, %s1600_s10  ;;  %1105 = vrot.lane.b32.xlu0 %v1084_v37, %s1599_s9  ;;  %v999_v19 = vmul.f32 %v1799_v30, %v1988_v5 }
 0x1b8   : > { %v1017_v37 = vmul.f32 %v1831_v46, %v999_v19  ;;  %v1153_v19 = vmul.f32 %v1819_v40, %v582_v21 }
 0x1ba   : > { %1185 = vrot.lane.b32.xlu1 %v1166_v60, %s1602_s13  ;;  %626 = vrot.lane.b32.xlu0 %v603_v35, %s1598_s30  ;;  %v1168_v60 = vmul.f32 %v1841_v52, %v1151_v16  ;;  %v670_v35 = vmul.f32 %v1779_v62, %v582_v21  ;;  %v1000_v16 = vmul.f32 %v1799_v30, %v1860_v2 }
 0x1be   : > { %1109 = vrot.lane.b32.xlu1 %v1086_v20, %s1599_s9  ;;  %872 = vrot.lane.b32.xlu0 %v849_v7, %s1597_s29  ;;  %v916_v20 = vmul.f32 %v1789_v23, %v582_v21  ;;  %v697_v7 = vmul.f32 %v1805_v33, %v670_v35 }
 0x1c0   : > { %v934_v43 = vmul.f32 %v1829_v45, %v916_v20  ;;  %v851_v20 = vmul.f32 %v1807_v34, %v1870_v10 }
 0x1c2   : > { %716 = vrot.lane.b32.xlu0 %v695_v11, %s1601_s12  ;;  %624 = vrot.lane.b32.xlu1 %v602_v56, %s1598_s30  ;;  %v764_v11 = vmul.f32 %v1781_v6, %v582_v21  ;;  %v669_v56 = vmul.f32 %v1779_v62, %v1860_v2 }
 0x1c4   : > { %v782_v38 = vmul.f32 %v1817_v39, %v764_v11  ;;  %v696_v17 = vmul.f32 %v1915_v8, %v669_v56  ;;  %v1170_v8 = vmul.f32 %v1839_v51, %v1153_v19 }
 0x1c6   : > { %801 = vrot.lane.b32.xlu0 %v780_v28, %s1603_s14  ;;  %870 = vrot.lane.b32.xlu1 %v848_v18, %s1597_s29  ;;  %v1001_v28 = vmul.f32 %v1799_v30, %v582_v21  ;;  %v763_v18 = vmul.f32 %v1781_v6, %v1860_v2  ;;  %v1018_v21 = vmul.f32 %v1926_v14, %v1000_v16 }
 0x1c8   : > { %v1019_v15 = vmul.f32 %v1833_v47, %v1001_v28  ;;  %v781_v62 = vmul.f32 %v1922_v13, %v763_v18 }
 0x1ca   : > { %953 = vrot.lane.b32.xlu0 %v932_v26, %s1604_s15  ;;  %1038 = vrot.lane.b32.xlu1 %v1017_v37, %s1600_s10  ;;  %v2069_v26 = vld [vmem:[#allocation2 + $0x30] sm:$0xff]  ;;  %v915_v37 = vmul.f32 %v1789_v23, %v1860_v2 }
 0x1cb   : > { %v604_v6 = vmul.f32 %v1783_v12, %v2069_v26  ;;  %v850_v23 = vmul.f32 %v1807_v34, %v2069_v26 }
 0x1cc   : > { %v933_v13 = vmul.f32 %v1947_v61, %v915_v37  ;;  %v549_v37 = vmul.f32 %v1845_v54, %v1856_v63 }
 0x1ce   : > { %1107 = vrot.lane.b32.xlu0 %v1085_v22, %s1599_s9  ;;  %1189 = vrot.lane.b32.xlu1 %v1168_v60, %s1602_s13  ;;  %v1152_v22 = vmul.f32 %v1819_v40, %v1860_v2  ;;  %v585_v60 = vld [vmem:[#allocation2 + $0x40] sm:$0xff]  ;;  %v671_v40 = vmul.f32 %v1801_v31, %v2069_v26 }
 0x1cf   : > { %v606_v61 = vmul.f32 %v1783_v12, %v585_v60  ;;  %v852_v14 = vmul.f32 %v1807_v34, %v585_v60  ;;  %v767_v56 = vmul.f32 %v1795_v27, %v585_v60  ;;  %v917_v34 = vmul.f32 %v1821_v41, %v2069_v26 }
 0x1d0   : > { %v1169_v30 = vmul.f32 %v1952_v0, %v1152_v22  ;;  %v698_v35 = vmul.f32 %v1791_v24, %v671_v40  ;;  %v1089_v0 = vmul.f32 %v1835_v49, %v585_v60  ;;  %v1088_v24 = vmul.f32 %v1835_v49, %v1870_v10 }
 0x1d1   : > { %v935_v28 = vmul.f32 %v1823_v42, %v917_v34  ;;  %v919_v18 = vmul.f32 %v1821_v41, %v585_v60 }
 0x1d2   : > { %720 = vrot.lane.b32.xlu0 %v697_v7, %s1601_s12  ;;  %957 = vrot.lane.b32.xlu1 %v934_v43, %s1604_s15  ;;  %v605_v7 = vmul.f32 %v1783_v12, %v1870_v10  ;;  %v765_v43 = vmul.f32 %v1795_v27, %v2069_v26 }
 0x1d4   : > { %v783_v11 = vmul.f32 %v1803_v32, %v765_v43  ;;  %v1002_v32 = vmul.f32 %v1827_v44, %v2069_v26 }
 0x1d6   : > { %805 = vrot.lane.b32.xlu0 %v782_v38, %s1603_s14  ;;  %718 = vrot.lane.b32.xlu1 %v696_v17, %s1601_s12  ;;  %v785_v17 = vmul.f32 %v1817_v39, %v767_v56  ;;  %v1020_v19 = vmul.f32 %v1831_v46, %v1002_v32 }
 0x1da   : > { %1042 = vrot.lane.b32.xlu0 %v1019_v15, %s1600_s10  ;;  %803 = vrot.lane.b32.xlu1 %v781_v62, %s1603_s14  ;;  %v937_v62 = vmul.f32 %v1829_v45, %v919_v18  ;;  %v1004_v45 = vmul.f32 %v1827_v44, %v585_v60 }
 0x1de   : > { %1193 = vrot.lane.b32.xlu0 %v1170_v8, %s1602_s13  ;;  %628 = vrot.lane.b32.xlu1 %v604_v6, %s1598_s30  ;;  %v673_v8 = vmul.f32 %v1801_v31, %v585_v60  ;;  %v548_v6 = vmul.f32 %v1863_v4, %v1845_v54  ;;  %v1087_v4 = vmul.f32 %v1835_v49, %v2069_v26 }
 0x1df   : > { %v1022_v54 = vmul.f32 %v1833_v47, %v1004_v45 }
 0x1e0   : > { %v700_v42 = vmul.f32 %v1805_v33, %v673_v8  ;;  %v565_v46 = vmul.f32 %v1742_v29, %v548_v6  ;;  %v566_v33 = vmul.f32 %v1734_v25, %v549_v37 }
 0x1e2   : > { %955 = vrot.lane.b32.xlu0 %v933_v13, %s1604_s15  ;;  %1040 = vrot.lane.b32.xlu1 %v1018_v21, %s1600_s10 }
 0x1e6   : > { %874 = vrot.lane.b32.xlu0 %v850_v23, %s1597_s29  ;;  %1191 = vrot.lane.b32.xlu1 %v1169_v30, %s1602_s13  ;;  %v1156_v23 = vmul.f32 %v1837_v50, %v585_v60  ;;  %v1287_v60 = vld [vmem:[%s2283_s6] sm:$0xf] }
 0x1ea   : > { %632 = vrot.lane.b32.xlu0 %v606_v61, %s1598_s30  ;;  %878 = vrot.lane.b32.xlu1 %v852_v14, %s1597_s29  ;;  %v1173_v14 = vmul.f32 %v1839_v51, %v1156_v23 }
 0x1ee   : > { %722 = vrot.lane.b32.xlu0 %v698_v35, %s1601_s12  ;;  %1115 = vrot.lane.b32.xlu1 %v1089_v0, %s1599_s9 }
 0x1f2   : > { %876 = vrot.lane.b32.xlu0 %v851_v20, %s1597_s29  ;;  %630 = vrot.lane.b32.xlu1 %v605_v7, %s1598_s30 }
 0x1f6   : > { %1113 = vrot.lane.b32.xlu0 %v1088_v24, %s1599_s9  ;;  %807 = vrot.lane.b32.xlu1 %v783_v11, %s1603_s14 }
 0x1f8   : > { %v863_v12 = vpop.permute.xlu0 %862  ;;  %v617_v38 = vpop.permute.xlu1 %616 }
 0x1fa   : > { %811 = vrot.lane.b32.xlu0 %v785_v17, %s1603_s14  ;;  %959 = vrot.lane.b32.xlu1 %v935_v28, %s1604_s15 }
 0x1fc   : > { %v621_v27 = vpop.permute.xlu0 %620  ;;  %v1100_v15 = vpop.permute.xlu1 %1099 }
 0x1fe   : > { %963 = vrot.lane.b32.xlu0 %v937_v62, %s1604_s15  ;;  %1044 = vrot.lane.b32.xlu1 %v1020_v19, %s1600_s10 }
 0x200   : > { %v867_v39 = vpop.permute.xlu0 %866  ;;  %v1104_v41 = vpop.permute.xlu1 %1103 }
 0x202   : > { %724 = vrot.lane.b32.xlu0 %v1918_v9, %s1601_s12  ;;  %726 = vrot.lane.b32.xlu1 %v700_v42, %s1601_s12 }
 0x204   : > { %v2140_v31 = vpop.permute.xlu0 %1032  ;;  %v619_v16 = vpop.permute.xlu1 %618 }
 0x205   : > { %v635_v44 = vsel %vm634_vm9, %v617_v38, %v619_v16  ;;  %v636_v63 = vsel %vm634_vm9, %v619_v16, %v621_v27 }
 0x206   : > { %v647_v9 = vadd.f32 %v635_v44, %v565_v46  ;;  %v648_v13 = vadd.f32 %v636_v63, %v566_v33  ;;  %1111 = vrot.lane.b32.xlu0 %v1087_v4, %s1599_s9  ;;  %1048 = vrot.lane.b32.xlu1 %v1022_v54, %s1600_s10 }
 0x208   : > { %v1102_v21 = vpop.permute.xlu0 %1101  ;;  %v711_v22 = vpop.permute.xlu1 %710 }
 0x209   : > { %v1118_v30 = vsel %vm1117_vm10, %v1100_v15, %v1102_v21  ;;  %v1119_v49 = vsel %vm1117_vm10, %v1102_v21, %v1104_v41 }
 0x20a   : > { %1046 = vrot.lane.b32.xlu0 %v1955_v1, %s1600_s10  ;;  %809 = vrot.lane.b32.xlu1 %v1958_v48, %s1603_s14  ;;  %v1154_v1 = vmul.f32 %v1837_v50, %v2069_v26 }
 0x20c   : > { %v1184_v47 = vpop.permute.xlu0 %1183  ;;  %v796_v61 = vpop.permute.xlu1 %795  ;;  %v1171_v20 = vmul.f32 %v1841_v52, %v1154_v1 }
 0x20e   : > { %1199 = vrot.lane.b32.xlu0 %v1173_v14, %s1602_s13  ;;  %961 = vrot.lane.b32.xlu1 %v1963_v36, %s1604_s15 }
 0x210   : > { %v715_v40 = vpop.permute.xlu0 %714  ;;  %v865_v35 = vpop.permute.xlu1 %864 }
 0x211   : > { %v881_v48 = vsel %vm880_vm11, %v863_v12, %v865_v35  ;;  %v882_v0 = vsel %vm880_vm11, %v865_v35, %v867_v39 }
 0x212   : > { %1290 = vperm.xlu0 %1522, %v1287_v60   ;;  %1197 = vrot.lane.b32.xlu1 %v1966_v3, %s1602_s13 }
 0x214   : > { %v800_v51 = vpop.permute.xlu0 %799  ;;  %v948_v36 = vpop.permute.xlu1 %947 }
 0x216   : > { %1195 = vrot.lane.b32.xlu1 %v1171_v20, %s1602_s13 }
 0x218   : > { %v1037_v7 = vpop.permute.xlu0 %1036  ;;  %v952_v43 = vpop.permute.xlu1 %951 }
 0x21c   : > { %v2173_v24 = vpop.permute.xlu0 %1187  ;;  %v713_v50 = vpop.permute.xlu1 %712 }
 0x21d   : > { %v729_v11 = vsel %vm728_vm12, %v711_v22, %v713_v50  ;;  %v730_v56 = vsel %vm728_vm12, %v713_v50, %v715_v40 }
 0x21e   : > { %v741_v34 = vadd.f32 %v729_v11, %v647_v9  ;;  %v742_v12 = vadd.f32 %v730_v56, %v648_v13 }
 0x220   : > { %v623_v3 = vpop.permute.xlu0 %622  ;;  %v798_v38 = vpop.permute.xlu1 %797 }
 0x221   : > { %v814_v17 = vsel %vm813_vm13, %v796_v61, %v798_v38  ;;  %v815_v52 = vsel %vm813_vm13, %v798_v38, %v800_v51 }
 0x222   : > { %v826_v28 = vadd.f32 %v814_v17, %v741_v34  ;;  %v827_v18 = vadd.f32 %v815_v52, %v742_v12 }
 0x224   : > { %v950_v32 = vpop.permute.xlu0 %949  ;;  %v893_v27 = vadd.f32 %v881_v48, %v826_v28  ;;  %v894_v15 = vadd.f32 %v882_v0, %v827_v18  ;;  %v869_v62 = vpop.permute.xlu1 %868 }
 0x225   : > { %v966_v19 = vsel %vm965_vm14, %v948_v36, %v950_v32  ;;  %v967_v8 = vsel %vm965_vm14, %v950_v32, %v952_v43 }
 0x226   : > { %v978_v39 = vadd.f32 %v966_v19, %v893_v27  ;;  %v979_v41 = vadd.f32 %v967_v8, %v894_v15 }
 0x228   : > { %v2181_v42 = vpop.permute.xlu0 %1105  ;;  %v1035_v6 = vpop.permute.xlu1 %1034 }
 0x229   : > { %v1051_v37 = vsel %vm1050_vm15, %v2140_v31, %v1035_v6  ;;  %v1052_v45 = vsel %vm1050_vm15, %v1035_v6, %v1037_v7 }
 0x22a   : > { %v1063_v46 = vadd.f32 %v1051_v37, %v978_v39  ;;  %v1064_v33 = vadd.f32 %v1052_v45, %v979_v41 }
 0x22c   : > { %v627_v16 = vpop.permute.xlu0 %626  ;;  %v1130_v4 = vadd.f32 %v1118_v30, %v1063_v46  ;;  %v1131_v54 = vadd.f32 %v1119_v49, %v1064_v33  ;;  %v1186_v44 = vpop.permute.xlu1 %1185  ;;  %v550_v30 = vmul.f32 %v1988_v5, %v1843_v53  ;;  %v551_v49 = vmul.f32 %v1843_v53, %v1860_v2 }
 0x22d   : > { %v1202_v63 = vsel %vm1201_vm0, %v1184_v47, %v1186_v44  ;;  %v1203_v12 = vsel %vm1201_vm0, %v1186_v44, %v2173_v24 }
 0x22e   : > { %v1214_v9 = vadd.f32 %v1202_v63, %v1130_v4  ;;  %v567_v20 = vmul.f32 %v1742_v29, %v550_v30  ;;  %v568_v7 = vmul.f32 %v1734_v25, %v551_v49  ;;  %v1215_v32 = vadd.f32 %v1203_v12, %v1131_v54 }
 0x230   : > { %v873_v13 = vpop.permute.xlu0 %872  ;;  %v1110_v21 = vpop.permute.xlu1 %1109  ;;  %v2206_v19 = vadd.f32 %v1853_v59, %v1214_v9  ;;  %v2211_v45 = vadd.f32 %v1853_v59, %v1215_v32 }
 0x232   : > { %v1452_v4 = vmul.f32 -1.442695, %v2206_v19  ;;  %v1453_v59 = vmul.f32 -1.442695, %v2211_v45 }
 0x234   : > { %v717_v22 = vpop.permute.xlu0 %716  ;;  %v625_v23 = vpop.permute.xlu1 %624  ;;  %1548 = vpow2.f32 %v1452_v4 }
 0x235   : > { %v637_v51 = vsel %vm634_vm9, %v623_v3, %v625_v23  ;;  %v638_v36 = vsel %vm634_vm9, %v625_v23, %v627_v16  ;;  %1550 = vpow2.f32 %v1453_v59 }
 0x236   : > { %v649_v11 = vadd.f32 %v637_v51, %v567_v20  ;;  %v650_v56 = vadd.f32 %v638_v36, %v568_v7 }
 0x238   : > { %v802_v61 = vpop.permute.xlu0 %801  ;;  %v871_v14 = vpop.permute.xlu1 %870 }
 0x239   : > { %v883_v27 = vsel %vm880_vm11, %v869_v62, %v871_v14  ;;  %v884_v15 = vsel %vm880_vm11, %v871_v14, %v873_v13 }
 0x23c   : > { %v954_v60 = vpop.permute.xlu0 %953  ;;  %v1039_v31 = vpop.permute.xlu1 %1038 }
 0x23e   : > { %v1549_v36 = vpop.eup %1548 }
 0x23f   : > { %v1551_v20 = vpop.eup %1550 }
 0x240   : > { %v1108_v40 = vpop.permute.xlu0 %1107  ;;  %v1190_v35 = vpop.permute.xlu1 %1189 }
 0x241   : > { %v1120_v13 = vsel %vm1117_vm10, %v2181_v42, %v1108_v40 }
 0x244   : > { %v721_v1 = vpop.permute.xlu0 %720  ;;  %v958_v48 = vpop.permute.xlu1 %957 }
 0x248   : > { %v806_v47 = vpop.permute.xlu0 %805  ;;  %v719_v0 = vpop.permute.xlu1 %718 }
 0x249   : > { %v731_v43 = vsel %vm728_vm12, %v717_v22, %v719_v0  ;;  %v732_v50 = vsel %vm728_vm12, %v719_v0, %v721_v1  ;;  %v1121_v22 = vsel %vm1117_vm10, %v1108_v40, %v1110_v21 }
 0x24a   : > { %v743_v3 = vadd.f32 %v731_v43, %v649_v11  ;;  %v744_v38 = vadd.f32 %v732_v50, %v650_v56  ;;  %v1262_v50 = vadd.f32 1.0, %v1549_v36  ;;  %v1263_v11 = vadd.f32 1.0, %v1551_v20 }
 0x24c   : > { %v1043_v5 = vpop.permute.xlu0 %1042  ;;  %v804_v34 = vpop.permute.xlu1 %803 }
 0x24d   : > { %v816_v53 = vsel %vm813_vm13, %v802_v61, %v804_v34  ;;  %v817_v2 = vsel %vm813_vm13, %v804_v34, %v806_v47 }
 0x24e   : > { %v828_v17 = vadd.f32 %v816_v53, %v743_v3  ;;  %v829_v52 = vadd.f32 %v817_v2, %v744_v38  ;;  %v552_v38 = vmul.f32 %v2069_v26, %v1849_v57 }
 0x250   : > { %v1194_v28 = vpop.permute.xlu0 %1193  ;;  %v2201_v18 = vpop.permute.xlu1 %628  ;;  %v895_v39 = vadd.f32 %v883_v27, %v828_v17  ;;  %v896_v41 = vadd.f32 %v884_v15, %v829_v52  ;;  %v553_v17 = vmul.f32 %v1849_v57, %v1870_v10 }
 0x254   : > { %v956_v8 = vpop.permute.xlu0 %955  ;;  %v1041_v6 = vpop.permute.xlu1 %1040 }
 0x255   : > { %v968_v24 = vsel %vm965_vm14, %v954_v60, %v956_v8  ;;  %v969_v37 = vsel %vm965_vm14, %v956_v8, %v958_v48  ;;  %v1053_v62 = vsel %vm1050_vm15, %v1039_v31, %v1041_v6  ;;  %v1054_v16 = vsel %vm1050_vm15, %v1041_v6, %v1043_v5 }
 0x256   : > { %v980_v46 = vadd.f32 %v968_v24, %v895_v39  ;;  %v981_v33 = vadd.f32 %v969_v37, %v896_v41  ;;  %v569_v39 = vmul.f32 %v1742_v29, %v552_v38  ;;  %v570_v41 = vmul.f32 %v1734_v25, %v553_v17 }
 0x258   : > { %v1065_v54 = vadd.f32 %v1053_v62, %v980_v46  ;;  %v1066_v44 = vadd.f32 %v1054_v16, %v981_v33  ;;  %v2216_v63 = vpop.permute.xlu0 %874  ;;  %v1192_v9 = vpop.permute.xlu1 %1191 }
 0x259   : > { %v1204_v14 = vsel %vm1201_vm0, %v1190_v35, %v1192_v9  ;;  %v1205_v60 = vsel %vm1201_vm0, %v1192_v9, %v1194_v28 }
 0x25a   : > { %v1132_v23 = vadd.f32 %v1120_v13, %v1065_v54  ;;  %v1133_v61 = vadd.f32 %v1121_v22, %v1066_v44 }
 0x25c   : > { %v1216_v31 = vadd.f32 %v1204_v14, %v1132_v23  ;;  %v1217_v1 = vadd.f32 %v1205_v60, %v1133_v61  ;;  %v633_v48 = vpop.permute.xlu0 %632  ;;  %v2224_v30 = vpop.permute.xlu1 %878 }
 0x25e   : > { %v1240_v49 = vadd.f32 %v1847_v55, %v1216_v31  ;;  %v1241_v42 = vadd.f32 %v1847_v55, %v1217_v1 }
 0x260   : > { %v1454_v21 = vmul.f32 -1.442695, %v1240_v49  ;;  %v723_v40 = vpop.permute.xlu0 %722  ;;  %v2228_v47 = vpop.permute.xlu1 %1115  ;;  %v1455_v0 = vmul.f32 -1.442695, %v1241_v42 }
 0x262   : > { %1552 = vpow2.f32 %v1454_v21 }
 0x263   : > { %1554 = vpow2.f32 %v1455_v0 }
 0x264   : > { %v877_v35 = vpop.permute.xlu0 %876  ;;  %v631_v51 = vpop.permute.xlu1 %630  ;;  %1556 = vrcp.f32 %v1262_v50 }
 0x265   : > { %1558 = vrcp.f32 %v1263_v11  ;;  %v639_v27 = vsel %vm634_vm9, %v2201_v18, %v631_v51  ;;  %v640_v15 = vsel %vm634_vm9, %v631_v51, %v633_v48  ;;  %v885_v61 = vsel %vm880_vm11, %v2216_v63, %v877_v35 }
 0x266   : > { %v651_v10 = vadd.f32 %v639_v27, %v569_v39  ;;  %v652_v46 = vadd.f32 %v640_v15, %v570_v41 }
 0x268   : > { %v2230_v7 = vpop.permute.xlu0 %1113  ;;  %v808_v43 = vpop.permute.xlu1 %807 }
 0x26c   : > { %v1553_v56 = vpop.eup %1552  ;;  %v812_v5 = vpop.permute.xlu0 %811 }
 0x26d   : > { %v960_v34 = vpop.permute.xlu1 %959  ;;  %v1555_v55 = vpop.eup %1554  ;;  %v1264_v53 = vadd.f32 1.0, %v1553_v56 }
 0x26e   : > { %v1265_v2 = vadd.f32 1.0, %v1555_v55  ;;  %v1557_v32 = vpop.eup %1556 }
 0x26f   : > { %1560 = vrcp.f32 %v1264_v53  ;;  %v1559_v8 = vpop.eup %1558  ;;  %v1280_v62 = vmul.f32 %v1557_v32, %v2206_v19  ;;  %v886_v19 = vsel %vm880_vm11, %v877_v35, %v2224_v30  ;;  %v1123_v30 = vsel %vm1117_vm10, %v2230_v7, %v2228_v47 }
 0x270   : > { %v964_v12 = vpop.permute.xlu0 %963  ;;  %1562 = vrcp.f32 %v1265_v2  ;;  %v1281_v29 = vmul.f32 %v1559_v8, %v2211_v45 }
 0x271   : > { %v1045_v3 = vpop.permute.xlu1 %1044 }
 0x274   : > { %v725_v52 = vpop.permute.xlu0 %724 }
 0x275   : > { %v727_v28 = vpop.permute.xlu1 %726  ;;  %v733_v26 = vsel %vm728_vm12, %v723_v40, %v725_v52 }
 0x276   : > { %v734_v37 = vsel %vm728_vm12, %v725_v52, %v727_v28  ;;  %v745_v4 = vadd.f32 %v733_v26, %v651_v10  ;;  %v2288_v26 = vld [vmem:[#allocation3_spill] sm:$0xff] }
 0x277   : > { %v746_v54 = vadd.f32 %v734_v37, %v652_v46 }
 0x278   : > { %v1112_v33 = vpop.permute.xlu0 %1111 }
 0x279   : > { %v1049_v6 = vpop.permute.xlu1 %1048  ;;  %v1561_v24 = vpop.eup %1560  ;;  %v1122_v20 = vsel %vm1117_vm10, %v1112_v33, %v2230_v7 }
 0x27a   : > { %v1563_v57 = vpop.eup %1562  ;;  %v1282_v18 = vmul.f32 %v1561_v24, %v1240_v49 }
 0x27b   : > { %v1283_v16 = vmul.f32 %v1563_v57, %v1241_v42 }
 0x27c   : > { %v1465_v25 = vpack.c.bf16 %v1282_v18, %v1280_v62  ;;  %v1047_v14 = vpop.permute.xlu0 %1046 }
 0x27d   : > { %v810_v44 = vpop.permute.xlu1 %809  ;;  %v1463_v23 = vpack.c.bf16 %v1283_v16, %v1281_v29  ;;  %v1055_v21 = vsel %vm1050_vm15, %v1045_v3, %v1047_v14  ;;  %v1056_v40 = vsel %vm1050_vm15, %v1047_v14, %v1049_v6  ;;  %v1572_v6 = vld [vmem:[%s1682_s16] sm:$0xff] }
 0x27e   : > { %v818_v9 = vsel %vm813_vm13, %v808_v43, %v810_v44  ;;  %v819_v13 = vsel %vm813_vm13, %v810_v44, %v812_v5 }
 0x27f   : > { %v830_v22 = vadd.f32 %v818_v9, %v745_v4  ;;  %v831_v59 = vadd.f32 %v819_v13, %v746_v54  ;;  %1464 = vmatprep.subr.bf16.mxu1 %v1463_v23 }
 0x280   : > { %1466 = vmatpush1.bf16.msra.mxu1 %v1465_v25  ;;  %v1200_v35 = vpop.permute.xlu0 %1199 }
 0x281   : > { %v897_v60 = vadd.f32 %v885_v61, %v830_v22  ;;  %v898_v31 = vadd.f32 %v886_v19, %v831_v59  ;;  %v962_v1 = vpop.permute.xlu1 %961 }
 0x282   : > { %v970_v45 = vsel %vm965_vm14, %v960_v34, %v962_v1  ;;  %v971_v48 = vsel %vm965_vm14, %v962_v1, %v964_v12 }
 0x283   : > { %v982_v49 = vadd.f32 %v970_v45, %v897_v60  ;;  %v983_v42 = vadd.f32 %v971_v48, %v898_v31 }
 0x285   : > { %v1067_v63 = vadd.f32 %v1055_v21, %v982_v49  ;;  %v1068_v0 = vadd.f32 %v1056_v40, %v983_v42  ;;  %v1198_v51 = vpop.permute.xlu1 %1197 }
 0x286   : > { %v1207_v43 = vsel %vm1201_vm0, %v1198_v51, %v1200_v35 }
 0x287   : > { %v1135_v36 = vadd.f32 %v1123_v30, %v1068_v0  ;;  %v1134_v11 = vadd.f32 %v1122_v20, %v1067_v63 }
 0x289   : > { %v1219_v50 = vadd.f32 %v1207_v43, %v1135_v36  ;;  %v1196_v56 = vpop.permute.xlu1 %1195 }
 0x28a   : > { %v1206_v5 = vsel %vm1201_vm0, %v1196_v56, %v1198_v51 }
 0x28b   : > { %v1243_v34 = vadd.f32 %v1851_v58, %v1219_v50  ;;  %v1218_v55 = vadd.f32 %v1206_v5, %v1134_v11 }
 0x28d   : > { %v1457_v53 = vmul.f32 -1.442695, %v1243_v34  ;;  %v1242_v2 = vadd.f32 %v1851_v58, %v1218_v55  ;;  %v1286_v58 = vld [vmem:[%s2282_s5] sm:$0xf] }
 0x28f   : > { %1564 = vpow2.f32 %v1457_v53  ;;  %v1456_v47 = vmul.f32 -1.442695, %v1242_v2 }
 0x291   : > { %1566 = vpow2.f32 %v1456_v47  ;;  %v1291_v27 = vpop.permute.xlu0 %1290 }
 0x299   : > { %v1565_v12 = vpop.eup %1564 }
 0x29a   : > { %v1267_v3 = vadd.f32 1.0, %v1565_v12 }
 0x29b   : > { %v1567_v38 = vpop.eup %1566 }
 0x29c   : > { %1568 = vrcp.f32 %v1267_v3  ;;  %v1266_v7 = vadd.f32 1.0, %v1567_v38 }
 0x29e   : > { %1570 = vrcp.f32 %v1266_v7 }
 0x2a6   : > { %v1569_v17 = vpop.eup %1568 }
 0x2a7   : > { %v1285_v52 = vmul.f32 %v1569_v17, %v1243_v34 }
 0x2a8   : > { %v1571_v28 = vpop.eup %1570 }
 0x2a9   : > { %1301 = vmatprep.subr.mxu1 %v1285_v52  ;;  %v1284_v32 = vmul.f32 %v1571_v28, %v1242_v2 }
 0x2ab   : > { %1302 = vmatpush1.msra.mxu1 %v1284_v32 }
 0x2ac   : > { %1458 = vmatmul.mubr.msk.f32.vlgmr.msra.gmra.mrb[0].mxu1 %vm1293_vm1, %v1286_v58 }
 0x37f   : > { %v1363_v15 = vpop.f32.mrb[0].mxu1 }
 0x380   : > { %v1364_v8 = vadd.f32 %v1363_v15, %v1291_v27  ;;  %v1365_v39 = vpop.f32.mrb[1].mxu1 }
 0x381   : > { %v1366_v41 = vadd.f32 %v1365_v39, %v1291_v27 }
 0x382   : > { %v1369_v24 = vadd.f32 %v1572_v6, %v1364_v8 }
 0x383   : > { %v1370_v37 = vadd.f32 %v1366_v41, %v2288_v26 }
 0x385   : > { %v1373_v57 = vcombine.low %v1369_v24, %v1370_v37 }
 0x387   : > { %1375 = vst [vmem:[%s305_s23] sm:$0xff] %v1373_v57 }
 0x388 PF: > { %s18_s27 = sadd.s32 1, %s1579_s27  }
 0x389   : > { %p15_p4 = scmp.ge.s32.totalorder %s18_s27, 4  }
 0x38b   :  { %17 = sbr.rel (!%p15_p4) target bundleno = 1 (0x1), region = 83 }

</bundles_post_ra>
